<compile_context>
chip_gen: v7x
topology: tpu7x:2x2x1
jax: 0.10.0
libtpu: 0.0.40
codegen_flags: <defaults>
</compile_context>

<pallas_src>
import jax
import jax.numpy as jnp
from jax.experimental import pallas as pl
from jax.experimental.pallas import tpu as pltpu

IN_FEATURES = 28 * 28    # 784 (no K pad; 784 = 98 * 8 sublanes, full-dim block)
HIDDEN1 = 256
HIDDEN2 = 64
HIDDEN2_PADDED = 128     # pad hidden2 to a full 128-lane MXU pass
OUT_FEATURES = 10
OUT_PADDED = 128         # lane-dense output store; sliced back to 10 in wrapper


def _round_up(x, m):
    return (x + m - 1) // m * m


def mlp_kernel(x_ref, w1_ref, b1_ref, w2_ref, b2_ref, w3_ref, b3_ref, o_ref):
    # in-kernel bf16 cast of the streamed f32 input (cheap VPU work under DMA)
    x = x_ref[...].astype(jnp.bfloat16)
    # fc1 + ReLU (bf16 x bf16 -> f32 accumulate; epilogue in f32)
    h1 = jnp.dot(x, w1_ref[...], preferred_element_type=jnp.float32)
    h1 = jnp.maximum(h1 + b1_ref[...], 0.0).astype(jnp.bfloat16)
    # fc2 + ReLU (N padded to 128; padded lanes stay 0 through ReLU)
    h2 = jnp.dot(h1, w2_ref[...], preferred_element_type=jnp.float32)
    h2 = jnp.maximum(h2 + b2_ref[...], 0.0).astype(jnp.bfloat16)
    # fc3 (no activation), lane-dense (TM, 128) bf16 store
    h3 = jnp.dot(h2, w3_ref[...], preferred_element_type=jnp.float32)
    o_ref[...] = (h3 + b3_ref[...]).astype(o_ref.dtype)


def neural_network_forward(x, params, *, tm=1024):
    """x: (B, 784) float32. params: bf16 weights (in, out) [padded], f32 biases (1, out)."""
    B, D = x.shape
    assert D == IN_FEATURES

    # Adapt the batch tile: big enough to amortize per-step overhead, but never
    # larger than the (16-rounded) batch. Multiple of 16 keeps bf16 output
    # tiles sublane-aligned when there are multiple grid steps.
    tm = max(16, min(tm, _round_up(B, 16)))
    n_tiles = pl.cdiv(B, tm)
    Bp = n_tiles * tm
    if Bp != B:
        # Batch-row-only pad (no feature pad / no dtype cast); padded rows are
        # independent and sliced off below.
        x = jnp.pad(x, ((0, Bp - B), (0, 0)))

    w1, b1 = params["w1"], params["b1"]
    w2, b2 = params["w2"], params["b2"]
    w3, b3 = params["w3"], params["b3"]

    out = pl.pallas_call(
        mlp_kernel,
        out_shape=jax.ShapeDtypeStruct((Bp, OUT_PADDED), jnp.bfloat16),
        grid_spec=pltpu.PrefetchScalarGridSpec(
            num_scalar_prefetch=0,
            grid=(n_tiles,),
            in_specs=[
                # x tile: the only streamed operand, pipelined over the batch axis
                pl.BlockSpec((tm, IN_FEATURES), lambda i: (i, 0)),
                # weights / biases: constant index_map -> DMA'd once, VMEM-resident
                pl.BlockSpec((IN_FEATURES, HIDDEN1), lambda i: (0, 0)),
                pl.BlockSpec((1, HIDDEN1), lambda i: (0, 0)),
                pl.BlockSpec((HIDDEN1, HIDDEN2_PADDED), lambda i: (0, 0)),
                pl.BlockSpec((1, HIDDEN2_PADDED), lambda i: (0, 0)),
                pl.BlockSpec((HIDDEN2_PADDED, OUT_PADDED), lambda i: (0, 0)),
                pl.BlockSpec((1, OUT_PADDED), lambda i: (0, 0)),
            ],
            out_specs=pl.BlockSpec((tm, OUT_PADDED), lambda i: (i, 0)),
        ),
        compiler_params=pltpu.CompilerParams(
            dimension_semantics=("parallel",),
            # headroom for tm>=1024 on v5e's 16 MiB scoped-VMEM default
            vmem_limit_bytes=64 * 1024 * 1024,
        ),
    )(x, w1, b1, w2, b2, w3, b3)

    return out[:B, :OUT_FEATURES].astype(jnp.float32)


def init_params(key):
    """Deterministic init mimicking nn.Linear (uniform +/- 1/sqrt(fan_in)).

    Weights are stored as bf16, transposed to (in, out), and zero-padded to
    lane-aligned shapes (hidden2: 64->128, fc3 N: 10->128). Biases stay f32.
    Zero pads keep padded lanes exactly 0 through bias-add / ReLU / fc3.
    """
    def linear(k, fan_in, fan_out, pad_in=None, pad_out=None):
        kw, kb = jax.random.split(k)
        bound = 1.0 / jnp.sqrt(float(fan_in))
        w = jax.random.uniform(kw, (fan_in, fan_out), jnp.float32, -bound, bound)
        b = jax.random.uniform(kb, (1, fan_out), jnp.float32, -bound, bound)
        pin = pad_in or fan_in
        pout = pad_out or fan_out
        wp = jnp.zeros((pin, pout), jnp.float32).at[:fan_in, :fan_out].set(w)
        bp = jnp.zeros((1, pout), jnp.float32).at[:, :fan_out].set(b)
        return wp.astype(jnp.bfloat16), bp

    k1, k2, k3 = jax.random.split(key, 3)
    w1, b1 = linear(k1, IN_FEATURES, HIDDEN1)
    w2, b2 = linear(k2, HIDDEN1, HIDDEN2, pad_out=HIDDEN2_PADDED)
    w3, b3 = linear(k3, HIDDEN2, OUT_FEATURES, pad_in=HIDDEN2_PADDED, pad_out=OUT_PADDED)
    return {"w1": w1, "b1": b1, "w2": w2, "b2": b2, "w3": w3, "b3": b3}


def reference_forward(x, params):
    """Pure-JAX reference matching the kernel's bf16-in / f32-accumulate numerics."""
    xb = x.astype(jnp.bfloat16).astype(jnp.float32)
    h = jnp.maximum(xb @ params["w1"].astype(jnp.float32) + params["b1"], 0.0)
    h = h.astype(jnp.bfloat16).astype(jnp.float32)
    h = jnp.maximum(h @ params["w2"].astype(jnp.float32) + params["b2"], 0.0)
    h = h.astype(jnp.bfloat16).astype(jnp.float32)
    out = h @ params["w3"].astype(jnp.float32) + params["b3"]
    # kernel stores logits as bf16; match that rounding
    return out[:, :OUT_FEATURES].astype(jnp.bfloat16).astype(jnp.float32)


if __name__ == "__main__":
    key = jax.random.PRNGKey(0)
    key, kx = jax.random.split(key)
    B = 32  # small test batch; tm adapts down so the single tile is (32, 784)
    x = jax.random.normal(kx, (B, IN_FEATURES), jnp.float32)
    params = init_params(key)

    out = jax.block_until_ready(neural_network_forward(x, params))
    ref = reference_forward(x, params)

    assert out.shape == (B, OUT_FEATURES) and out.dtype == jnp.float32
    assert jnp.allclose(out, ref, atol=2e-2, rtol=2e-2), float(jnp.max(jnp.abs(out - ref)))
    print("KERNEL_OK")
</pallas_src>

<mosaic_0001>
module attributes {stable_mosaic.version = 11 : i64} {
  func.func @mlp_kernel(%arg0: i32, %arg1: memref<32x784xf32, #tpu.memory_space<vmem>>, %arg2: memref<784x256xbf16, #tpu.memory_space<vmem>>, %arg3: memref<1x256xf32, #tpu.memory_space<vmem>>, %arg4: memref<256x128xbf16, #tpu.memory_space<vmem>>, %arg5: memref<1x128xf32, #tpu.memory_space<vmem>>, %arg6: memref<128x128xbf16, #tpu.memory_space<vmem>>, %arg7: memref<1x128xf32, #tpu.memory_space<vmem>>, %arg8: memref<32x128xbf16, #tpu.memory_space<vmem>>) attributes {dimension_semantics = [#tpu.dimension_semantics<parallel>], iteration_bounds = array<i64: 1>, scalar_prefetch = 0 : i64, scratch_operands = 0 : i64, tpu.core_type = #tpu.core_type<tc>, window_params = [{transform_indices = @transform_0, window_bounds = array<i64: 32, 784>}, {pipeline_mode = #tpu.pipeline_mode<synchronous>, transform_indices = @transform_1, window_bounds = array<i64: 784, 256>}, {pipeline_mode = #tpu.pipeline_mode<synchronous>, transform_indices = @transform_2, window_bounds = array<i64: 1, 256>}, {pipeline_mode = #tpu.pipeline_mode<synchronous>, transform_indices = @transform_3, window_bounds = array<i64: 256, 128>}, {pipeline_mode = #tpu.pipeline_mode<synchronous>, transform_indices = @transform_4, window_bounds = array<i64: 1, 128>}, {pipeline_mode = #tpu.pipeline_mode<synchronous>, transform_indices = @transform_5, window_bounds = array<i64: 128, 128>}, {pipeline_mode = #tpu.pipeline_mode<synchronous>, transform_indices = @transform_6, window_bounds = array<i64: 1, 128>}, {transform_indices = @transform_7, window_bounds = array<i64: 32, 128>}]} {
    %c0 = arith.constant 0 : index
    %c0_0 = arith.constant 0 : index
    %0 = vector.load %arg1[%c0, %c0_0] : memref<32x784xf32, #tpu.memory_space<vmem>>, vector<32x784xf32>
    %1 = arith.truncf %0 : vector<32x784xf32> to vector<32x784xbf16>
    %c0_1 = arith.constant 0 : index
    %c0_2 = arith.constant 0 : index
    %2 = vector.load %arg2[%c0_1, %c0_2] : memref<784x256xbf16, #tpu.memory_space<vmem>>, vector<784x256xbf16>
    %cst = arith.constant dense<0.000000e+00> : vector<32x256xf32>
    %3 = tpu.matmul %1, %2, %cst {dimension_numbers = #tpu.dot_dimension_numbers<[1], [0], [0], [1], [0, 0, 1, 1], [], []>} : vector<32x784xbf16>, vector<784x256xbf16>, vector<32x256xf32> -> vector<32x256xf32>
    %c0_3 = arith.constant 0 : index
    %c0_4 = arith.constant 0 : index
    %4 = vector.load %arg3[%c0_3, %c0_4] : memref<1x256xf32, #tpu.memory_space<vmem>>, vector<1x256xf32>
    %5 = vector.broadcast %4 : vector<1x256xf32> to vector<32x256xf32>
    %6 = arith.addf %3, %5 : vector<32x256xf32>
    %cst_5 = arith.constant 0.000000e+00 : f32
    %7 = vector.broadcast %cst_5 : f32 to vector<32x256xf32>
    %8 = arith.maximumf %6, %7 : vector<32x256xf32>
    %9 = arith.truncf %8 : vector<32x256xf32> to vector<32x256xbf16>
    %c0_6 = arith.constant 0 : index
    %c0_7 = arith.constant 0 : index
    %10 = vector.load %arg4[%c0_6, %c0_7] : memref<256x128xbf16, #tpu.memory_space<vmem>>, vector<256x128xbf16>
    %cst_8 = arith.constant dense<0.000000e+00> : vector<32x128xf32>
    %11 = tpu.matmul %9, %10, %cst_8 {dimension_numbers = #tpu.dot_dimension_numbers<[1], [0], [0], [1], [0, 0, 1, 1], [], []>} : vector<32x256xbf16>, vector<256x128xbf16>, vector<32x128xf32> -> vector<32x128xf32>
    %c0_9 = arith.constant 0 : index
    %c0_10 = arith.constant 0 : index
    %12 = vector.load %arg5[%c0_9, %c0_10] : memref<1x128xf32, #tpu.memory_space<vmem>>, vector<1x128xf32>
    %13 = vector.broadcast %12 : vector<1x128xf32> to vector<32x128xf32>
    %14 = arith.addf %11, %13 : vector<32x128xf32>
    %cst_11 = arith.constant 0.000000e+00 : f32
    %15 = vector.broadcast %cst_11 : f32 to vector<32x128xf32>
    %16 = arith.maximumf %14, %15 : vector<32x128xf32>
    %17 = arith.truncf %16 : vector<32x128xf32> to vector<32x128xbf16>
    %c0_12 = arith.constant 0 : index
    %c0_13 = arith.constant 0 : index
    %18 = vector.load %arg6[%c0_12, %c0_13] : memref<128x128xbf16, #tpu.memory_space<vmem>>, vector<128x128xbf16>
    %cst_14 = arith.constant dense<0.000000e+00> : vector<32x128xf32>
    %19 = tpu.matmul %17, %18, %cst_14 {dimension_numbers = #tpu.dot_dimension_numbers<[1], [0], [0], [1], [0, 0, 1, 1], [], []>} : vector<32x128xbf16>, vector<128x128xbf16>, vector<32x128xf32> -> vector<32x128xf32>
    %c0_15 = arith.constant 0 : index
    %c0_16 = arith.constant 0 : index
    %20 = vector.load %arg7[%c0_15, %c0_16] : memref<1x128xf32, #tpu.memory_space<vmem>>, vector<1x128xf32>
    %21 = vector.broadcast %20 : vector<1x128xf32> to vector<32x128xf32>
    %22 = arith.addf %19, %21 : vector<32x128xf32>
    %23 = arith.truncf %22 : vector<32x128xf32> to vector<32x128xbf16>
    %c0_17 = arith.constant 0 : index
    %c0_18 = arith.constant 0 : index
    %24 = vector.load %arg8[%c0_17, %c0_18] : memref<32x128xbf16, #tpu.memory_space<vmem>>, vector<32x128xbf16>
    tpu.vector_store %arg8[%c0_17, %c0_18], %23 {strides = array<i32>} : memref<32x128xbf16, #tpu.memory_space<vmem>>, vector<32x128xbf16>,
    return
  }
  func.func @transform_0(%arg0: i32) -> (i32, i32) {
    %c0_i32 = arith.constant 0 : i32
    %c0_i32_0 = arith.constant 0 : i32
    return %arg0, %c0_i32 : i32, i32
  }
  func.func @transform_1(%arg0: i32) -> (i32, i32) {
    %c0_i32 = arith.constant 0 : i32
    %c0_i32_0 = arith.constant 0 : i32
    %c0_i32_1 = arith.constant 0 : i32
    return %c0_i32, %c0_i32_0 : i32, i32
  }
  func.func @transform_2(%arg0: i32) -> (i32, i32) {
    %c0_i32 = arith.constant 0 : i32
    %c0_i32_0 = arith.constant 0 : i32
    %c0_i32_1 = arith.constant 0 : i32
    return %c0_i32, %c0_i32_0 : i32, i32
  }
  func.func @transform_3(%arg0: i32) -> (i32, i32) {
    %c0_i32 = arith.constant 0 : i32
    %c0_i32_0 = arith.constant 0 : i32
    %c0_i32_1 = arith.constant 0 : i32
    return %c0_i32, %c0_i32_0 : i32, i32
  }
  func.func @transform_4(%arg0: i32) -> (i32, i32) {
    %c0_i32 = arith.constant 0 : i32
    %c0_i32_0 = arith.constant 0 : i32
    %c0_i32_1 = arith.constant 0 : i32
    return %c0_i32, %c0_i32_0 : i32, i32
  }
  func.func @transform_5(%arg0: i32) -> (i32, i32) {
    %c0_i32 = arith.constant 0 : i32
    %c0_i32_0 = arith.constant 0 : i32
    %c0_i32_1 = arith.constant 0 : i32
    return %c0_i32, %c0_i32_0 : i32, i32
  }
  func.func @transform_6(%arg0: i32) -> (i32, i32) {
    %c0_i32 = arith.constant 0 : i32
    %c0_i32_0 = arith.constant 0 : i32
    %c0_i32_1 = arith.constant 0 : i32
    return %c0_i32, %c0_i32_0 : i32, i32
  }
  func.func @transform_7(%arg0: i32) -> (i32, i32) {
    %c0_i32 = arith.constant 0 : i32
    %c0_i32_0 = arith.constant 0 : i32
    return %arg0, %c0_i32 : i32, i32
  }
}

</mosaic_0001>

<bundles_post_ra>
// kernel: tpu_custom_call.1
= control target key start
LH: loop header
LB: loop body
LE: loop exit
PB: predicated region body
PF: predicated region fallthrough
CT: control target
= control target key end

     0   :  { %12 = vsyncpa [#allocation3], 0  ;;  %s2120_s0 = inlined_call_operand.hbm [shape: f32[32,784], index: 0, kind: input, shape index: {}]   ;;  %s2121_s1 = inlined_call_operand.hbm [shape: bf16[784,256], index: 1, kind: input, shape index: {}]   ;;  %s2122_s2 = inlined_call_operand.hbm [shape: f32[1,256], index: 2, kind: input, shape index: {}]   ;;  %s2123_s3 = inlined_call_operand.hbm [shape: bf16[256,128], index: 3, kind: input, shape index: {}]   ;;  %s2124_s4 = inlined_call_operand.hbm [shape: f32[1,128], index: 4, kind: input, shape index: {}]   ;;  %s2125_s5 = inlined_call_operand.hbm [shape: bf16[128,128], index: 5, kind: input, shape index: {}]   ;;  %s2126_s6 = inlined_call_operand.hbm [shape: f32[1,128], index: 6, kind: input, shape index: {}]   ;;  %s2127_s7 = inlined_call_operand.hbm [shape: bf16[32,128], index: 7, kind: output, shape index: {}]  }
   0x1   :  { %13 = vsyncpa [#allocation6], 0 }
   0x2   :  { %14 = vsyncpa [#allocation9], 0 }
   0x3   :  { %15 = vsyncpa [#allocation12], 0 }
   0x4   :  { %16 = vsyncpa [#allocation4], 0  ;;  %s1947_s24 = smov [#allocation5]   ;;  %s1761_s28 = scalar_lea.hbm %s2121_s1, 12544 }
   0x5   :  { %s34_s25 = sshll.u32 %s1947_s24, 4  ;;  %p1762_p0 = scmp.ne.s32.totalorder %s2121_s1, %s1761_s28  ;;  %s35_s25 = int_to_ptr.vmem [resolvable:$true] %s34_s25 }
   0x6   :  { %p1765_p1 = scmp.lt.u32.totalorder %s1761_s28, %s2121_s1 }
   0x8   :  { %p1767_p2 = pnand %p1765_p1, %p1762_p0 }
   0xa   :  { %1770 = shalt.err (!%p1767_p2)
}
   0xb   :  { %s1771_s10 = scalar_lea.vmem %s35_s25, 12544  ;;  %p1776_p4 = scmp.lt.s32.totalorder %s35_s25, %s35_s25 }
   0xc   :  { %p1772_p3 = scmp.ne.s32.totalorder %s35_s25, %s1771_s10  ;;  %p1777_p5 = scmp.lt.s32.totalorder %s1771_s10, %s1771_s10 }
   0xe   :  { %p1778_p6 = por %p1777_p5, %p1776_p4 }
  0x10   :  { %p1779_p7 = pnand %p1778_p6, %p1772_p3 }
  0x12   :  { %1782 = shalt.err (!%p1779_p7)
}
  0x13   :  { %s1948_s11 = smov 128   ;;  %s1949_s12 = smov 8  }
  0x14   :  { %40 = dma.hbm_to_vmem [thread:$0]  %s2121_s1, 12544, %s35_s25, [#allocation6], %s1948_s11, %s1948_s11, %s1949_s12  }
  0x15   :  { %s1950_s15 = smov [#allocation8]   ;;  %s1783_s19 = scalar_lea.hbm %s2123_s3, 2048 }
  0x16   :  { %s56_s16 = sshll.u32 %s1950_s15, 4  ;;  %p1784_p8 = scmp.ne.s32.totalorder %s2123_s3, %s1783_s19  ;;  %s57_s16 = int_to_ptr.vmem [resolvable:$true] %s56_s16 }
  0x17   :  { %p1787_p9 = scmp.lt.u32.totalorder %s1783_s19, %s2123_s3 }
  0x19   :  { %p1789_p10 = pnand %p1787_p9, %p1784_p8 }
  0x1b   :  { %1792 = shalt.err (!%p1789_p10)
}
  0x1c   :  { %s1793_s24 = scalar_lea.vmem %s57_s16, 2048  ;;  %p1798_p12 = scmp.lt.s32.totalorder %s57_s16, %s57_s16 }
  0x1d   :  { %p1794_p11 = scmp.ne.s32.totalorder %s57_s16, %s1793_s24  ;;  %p1799_p13 = scmp.lt.s32.totalorder %s1793_s24, %s1793_s24 }
  0x1f   :  { %p1800_p0 = por %p1799_p13, %p1798_p12 }
  0x21   :  { %p1801_p1 = pnand %p1800_p0, %p1794_p11 }
  0x23   :  { %1804 = shalt.err (!%p1801_p1)
}
  0x24   :  { %s1951_s1 = smov 64   ;;  %s1952_s25 = smov 4  }
  0x25   :  { %62 = dma.hbm_to_vmem [thread:$0]  %s2123_s3, 2048, %s57_s16, [#allocation9], %s1951_s1, %s1951_s1, %s1952_s25  }
  0x26   :  { %s1953_s28 = smov [#allocation11]   ;;  %s1954_s30 = smov [#allocation2]  }
  0x27   :  { %s78_s29 = sshll.u32 %s1953_s28, 4  ;;  %s22_s8 = sshll.u32 %s1954_s30, 4  ;;  %s79_s29 = int_to_ptr.vmem [resolvable:$true] %s78_s29  ;;  %s2029_s8 = int_to_ptr.vmem [resolvable:$true] %s22_s8 }
  0x28   :  { %s1805_s11 = scalar_lea.hbm %s2125_s5, 1024 }
  0x29   :  { %p1806_p2 = scmp.ne.s32.totalorder %s2125_s5, %s1805_s11  ;;  %p1809_p3 = scmp.lt.u32.totalorder %s1805_s11, %s2125_s5 }
  0x2b   :  { %p1811_p4 = pnand %p1809_p3, %p1806_p2 }
  0x2d   :  { %1814 = shalt.err (!%p1811_p4)
}
  0x2e   :  { %s1815_s3 = scalar_lea.vmem %s79_s29, 1024  ;;  %p1820_p6 = scmp.lt.s32.totalorder %s79_s29, %s79_s29 }
  0x2f   :  { %p1816_p5 = scmp.ne.s32.totalorder %s79_s29, %s1815_s3  ;;  %p1821_p7 = scmp.lt.s32.totalorder %s1815_s3, %s1815_s3 }
  0x31   :  { %p1822_p8 = por %p1821_p7, %p1820_p6 }
  0x33   :  { %p1823_p9 = pnand %p1822_p8, %p1816_p5 }
  0x35   :  { %1826 = shalt.err (!%p1823_p9)
}
  0x36   :  { %84 = dma.hbm_to_vmem [thread:$0]  %s2125_s5, 1024, %s79_s29, [#allocation12], %s1951_s1, %s1951_s1, %s1952_s25  }
  0x37   :  { %s1827_s20 = scalar_lea.hbm %s2120_s0, 3584 }
  0x38   :  { %p1828_p10 = scmp.ne.s32.totalorder %s2120_s0, %s1827_s20  ;;  %p1831_p11 = scmp.lt.u32.totalorder %s1827_s20, %s2120_s0 }
  0x3a   :  { %p1833_p12 = pnand %p1831_p11, %p1828_p10 }
  0x3c   :  { %1836 = shalt.err (!%p1833_p12)
}
  0x3d   :  { %s1837_s26 = scalar_lea.vmem %s2029_s8, 3584  ;;  %p1842_p0 = scmp.lt.s32.totalorder %s2029_s8, %s2029_s8 }
  0x3e   :  { %p1838_p13 = scmp.ne.s32.totalorder %s2029_s8, %s1837_s26  ;;  %p1843_p1 = scmp.lt.s32.totalorder %s1837_s26, %s1837_s26 }
  0x40   :  { %p1844_p2 = por %p1843_p1, %p1842_p0 }
  0x42   :  { %p1845_p3 = pnand %p1844_p2, %p1838_p13 }
  0x44   :  { %1848 = shalt.err (!%p1845_p3)
}
  0x45   :  { %s1955_s5 = smov 896   ;;  %s1956_s27 = smov 56  }
  0x46   :  { %28 = dma.hbm_to_vmem [thread:$0]  %s2120_s0, 3584, %s2029_s8, [#allocation3], %s1955_s5, %s1955_s5, %s1956_s27  }
  0x47   :  { %s1957_s30 = smov [#allocation7]   ;;  %s1958_s10 = smov [#allocation10]  }
  0x48   :  { %s47_s9 = sshll.u32 %s1957_s30, 4  ;;  %s69_s11 = sshll.u32 %s1958_s10, 4  ;;  %s48_s9 = int_to_ptr.vmem [resolvable:$true] %s47_s9  ;;  %s70_s11 = int_to_ptr.vmem [resolvable:$true] %s69_s11 }
  0x49   :  { %s1849_s14 = scalar_lea.hbm %s2122_s2, 32 }
  0x4a   :  { %p1850_p4 = scmp.ne.s32.totalorder %s2122_s2, %s1849_s14  ;;  %p1853_p5 = scmp.lt.u32.totalorder %s1849_s14, %s2122_s2 }
  0x4c   :  { %p1855_p6 = pnand %p1853_p5, %p1850_p4 }
  0x4e   :  { %1858 = shalt.err (!%p1855_p6)
}
  0x4f   :  { %s1859_s0 = scalar_lea.vmem %s48_s9, 32  ;;  %p1864_p8 = scmp.lt.s32.totalorder %s48_s9, %s48_s9 }
  0x50   :  { %p1860_p7 = scmp.ne.s32.totalorder %s48_s9, %s1859_s0  ;;  %p1865_p9 = scmp.lt.s32.totalorder %s1859_s0, %s1859_s0 }
  0x52   :  { %p1866_p10 = por %p1865_p9, %p1864_p8 }
  0x54   :  { %p1867_p11 = pnand %p1866_p10, %p1860_p7 }
  0x56   :  { %1870 = shalt.err (!%p1867_p11)
}
  0x57   :  { %50 = dma.hbm_to_vmem [thread:$0]  %s2122_s2, 32, %s48_s9, [#allocation6]  }
  0x58   :  { %s1871_s21 = scalar_lea.hbm %s2124_s4, 16 }
  0x59   :  { %p1872_p12 = scmp.ne.s32.totalorder %s2124_s4, %s1871_s21  ;;  %p1875_p13 = scmp.lt.u32.totalorder %s1871_s21, %s2124_s4 }
  0x5b   :  { %p1877_p0 = pnand %p1875_p13, %p1872_p12 }
  0x5d   :  { %1880 = shalt.err (!%p1877_p0)
}
  0x5e   :  { %s1881_s5 = scalar_lea.vmem %s70_s11, 16  ;;  %s1885_s27 = scalar_lea.vmem %s70_s11, 32 }
  0x5f   :  { %p1882_p1 = scmp.ne.s32.totalorder %s70_s11, %s1881_s5  ;;  %p1886_p2 = scmp.lt.s32.totalorder %s70_s11, %s70_s11 }
  0x60   :  { %p1887_p3 = scmp.lt.s32.totalorder %s1885_s27, %s1881_s5 }
  0x62   :  { %p1888_p4 = por %p1887_p3, %p1886_p2 }
  0x64   :  { %p1889_p5 = pnand %p1888_p4, %p1882_p1 }
  0x66   :  { %1892 = shalt.err (!%p1889_p5)
}
  0x67   :  { %72 = dma.hbm_to_vmem [thread:$0]  %s2124_s4, 16, %s70_s11, [#allocation9]  }
  0x68   :  { %s1959_s29 = smov [#allocation13]   ;;  %s1893_s12 = scalar_lea.hbm %s2126_s6, 16 }
  0x69   :  { %s91_s30 = sshll.u32 %s1959_s29, 4  ;;  %p1894_p6 = scmp.ne.s32.totalorder %s2126_s6, %s1893_s12  ;;  %s92_s30 = int_to_ptr.vmem [resolvable:$true] %s91_s30 }
  0x6a   :  { %p1897_p7 = scmp.lt.u32.totalorder %s1893_s12, %s2126_s6 }
  0x6c   :  { %p1899_p8 = pnand %p1897_p7, %p1894_p6 }
  0x6e   :  { %1902 = shalt.err (!%p1899_p8)
}
  0x6f   :  { %s1903_s16 = scalar_lea.vmem %s92_s30, 16  ;;  %s1907_s4 = scalar_lea.vmem %s92_s30, 32 }
  0x70   :  { %p1904_p9 = scmp.ne.s32.totalorder %s92_s30, %s1903_s16  ;;  %p1908_p10 = scmp.lt.s32.totalorder %s92_s30, %s92_s30 }
  0x71   :  { %p1909_p11 = scmp.lt.s32.totalorder %s1907_s4, %s1903_s16 }
  0x73   :  { %p1910_p12 = por %p1909_p11, %p1908_p10 }
  0x75   :  { %p1911_p13 = pnand %p1910_p12, %p1904_p9 }
  0x77   :  { %1914 = shalt.err (!%p1911_p13)
}
  0x78   :  { %94 = dma.hbm_to_vmem [thread:$0]  %s2126_s6, 16, %s92_s30, [#allocation12]  }
  0x79   :  { %1937 = dma.done.wait [#allocation3], 3584  }
  0x7a   :  { %1938 = vsyncadd [#allocation3], 4294963712 }
  0x7b   :  { %1939 = dma.done.wait [#allocation6], 12576  }
  0x7c   :  { %1940 = vsyncadd [#allocation6], 4294954720 }
  0x7d   :  { %1941 = dma.done.wait [#allocation9], 2064  }
  0x7e   :  { %1942 = vsyncadd [#allocation9], 4294965232 }
  0x7f   :  { %1943 = dma.done.wait [#allocation12], 1040  }
  0x80   :  { %1944 = vsyncadd [#allocation12], 4294966256  ;;  %v1590_v0 = vld [vmem:[#allocation5 + $0x104] ss:$8 sps:$4 sm:$0xff]   ;;  %v1592_v1 = vld [vmem:[#allocation5 + $0x100] ss:$8 sps:$4 sm:$0xff]  }
  0x81   :  { %819 = vmatprep.subr.bf16.mxu0 %v1590_v0  ;;  %v1593_v2 = vld [vmem:[#allocation5 + $0x114] ss:$8 sps:$4 sm:$0xff]   ;;  %v1595_v3 = vld [vmem:[#allocation5 + $0x110] ss:$8 sps:$4 sm:$0xff]   ;;  %v1596_v4 = vld [vmem:[#allocation5 + $0x124] ss:$8 sps:$4 sm:$0xff]  }
  0x82   :  { %820 = vmatpush1.bf16.msra.mxu0 %v1592_v1  ;;  %v1598_v5 = vld [vmem:[#allocation5 + $0x120] ss:$8 sps:$4 sm:$0xff]   ;;  %v1599_v6 = vld [vmem:[#allocation5 + $0x134] ss:$8 sps:$4 sm:$0xff]   ;;  %v1601_v7 = vld [vmem:[#allocation5 + $0x130] ss:$8 sps:$4 sm:$0xff]  }
  0x83   :  { %821 = vmatprep.subr.bf16.mxu0 %v1593_v2  ;;  %v1602_v8 = vld [vmem:[#allocation5 + $0x144] ss:$8 sps:$4 sm:$0xff]   ;;  %v1604_v9 = vld [vmem:[#allocation5 + $0x140] ss:$8 sps:$4 sm:$0xff]   ;;  %v1605_v10 = vld [vmem:[#allocation5 + $0x154] ss:$8 sps:$4 sm:$0xff]  }
  0x84   :  { %v1626_v11 = vld [vmem:[#allocation5 + $0x4] ss:$8 sps:$4 sm:$0xff]   ;;  %v1628_v12 = vld [vmem:[#allocation5] ss:$8 sps:$4 sm:$0xff]   ;;  %v1607_v13 = vld [vmem:[#allocation5 + $0x150] ss:$8 sps:$4 sm:$0xff]  }
  0x85   :  { %766 = vmatprep.subr.bf16.mxu1 %v1626_v11  ;;  %v1632_v14 = vld [vmem:[#allocation5 + $0x14] ss:$8 sps:$4 sm:$0xff]   ;;  %v1634_v15 = vld [vmem:[#allocation5 + $0x10] ss:$8 sps:$4 sm:$0xff]   ;;  %v1608_v16 = vld [vmem:[#allocation5 + $0x164] ss:$8 sps:$4 sm:$0xff]  }
  0x86   :  { %822 = vmatpush1.bf16.msra.mxu0 %v1595_v3  ;;  %767 = vmatpush1.bf16.msra.mxu1 %v1628_v12  ;;  %v1610_v17 = vld [vmem:[#allocation5 + $0x160] ss:$8 sps:$4 sm:$0xff]   ;;  %v1638_v18 = vld [vmem:[#allocation5 + $0x24] ss:$8 sps:$4 sm:$0xff]   ;;  %v1611_v19 = vld [vmem:[#allocation5 + $0x174] ss:$8 sps:$4 sm:$0xff]  }
  0x87   :  { %823 = vmatprep.subr.bf16.mxu0 %v1596_v4  ;;  %768 = vmatprep.subr.bf16.mxu1 %v1632_v14  ;;  %v1640_v20 = vld [vmem:[#allocation5 + $0x20] ss:$8 sps:$4 sm:$0xff]   ;;  %v1644_v21 = vld [vmem:[#allocation5 + $0x34] ss:$8 sps:$4 sm:$0xff]   ;;  %v1613_v22 = vld [vmem:[#allocation5 + $0x170] ss:$8 sps:$4 sm:$0xff]  }
  0x88   :  { %v1614_v23 = vld [vmem:[#allocation5 + $0x184] ss:$8 sps:$4 sm:$0xff]   ;;  %v1646_v24 = vld [vmem:[#allocation5 + $0x30] ss:$8 sps:$4 sm:$0xff]   ;;  %v1616_v29 = vld [vmem:[#allocation5 + $0x180] ss:$8 sps:$4 sm:$0xff]  }
  0x89   :  { %v1650_v25 = vld [vmem:[#allocation5 + $0x44] ss:$8 sps:$4 sm:$0xff]   ;;  %v120_v26 = vld [vmem:[#allocation2 + $0x18] sm:$0xff]  ;;  %v127_v27 = vld [vmem:[#allocation2 + $0x50] sm:$0xff]  ;;  %vm759_vm0 = vcmask 130048   ;;  %s1961_s6 = smov [#allocation14]  }
  0x8a   :  { %824 = vmatpush1.bf16.msra.mxu0 %v1598_v5  ;;  %769 = vmatpush1.bf16.msra.mxu1 %v1634_v15  ;;  %v148_v28 = vpack.c.bf16 %v127_v27, %v120_v26  ;;  %v1617_v30 = vld [vmem:[#allocation5 + $0x194] ss:$8 sps:$4 sm:$0xff]   ;;  %v1652_v31 = vld [vmem:[#allocation5 + $0x40] ss:$8 sps:$4 sm:$0xff]   ;;  %v1619_v33 = vld [vmem:[#allocation5 + $0x190] ss:$8 sps:$4 sm:$0xff]  }
  0x8b   :  { %825 = vmatprep.subr.bf16.mxu0 %v1599_v6  ;;  %770 = vmatprep.subr.bf16.mxu1 %v1638_v18  ;;  %v1656_v32 = vld [vmem:[#allocation5 + $0x54] ss:$8 sps:$4 sm:$0xff]   ;;  %v1620_v34 = vld [vmem:[#allocation5 + $0x1a4] ss:$8 sps:$4 sm:$0xff]   ;;  %v1658_v35 = vld [vmem:[#allocation5 + $0x50] ss:$8 sps:$4 sm:$0xff]  }
  0x8c   :  { %851 = vmatprep.mubr.bf16.mxu0 %v148_v28  ;;  %v1662_v36 = vld [vmem:[#allocation5 + $0x64] ss:$8 sps:$4 sm:$0xff]   ;;  %v1622_v37 = vld [vmem:[#allocation5 + $0x1a0] ss:$8 sps:$4 sm:$0xff]   ;;  %v1623_v38 = vld [vmem:[#allocation5 + $0x1b4] ss:$8 sps:$4 sm:$0xff]  }
  0x8d   :  { %v1664_v39 = vld [vmem:[#allocation5 + $0x60] ss:$8 sps:$4 sm:$0xff]   ;;  %v1668_v40 = vld [vmem:[#allocation5 + $0x74] ss:$8 sps:$4 sm:$0xff]   ;;  %v1625_v41 = vld [vmem:[#allocation5 + $0x1b0] ss:$8 sps:$4 sm:$0xff]  }
  0x8e   :  { %826 = vmatpush1.bf16.msra.mxu0 %v1601_v7  ;;  %771 = vmatpush1.bf16.msra.mxu1 %v1640_v20  ;;  %v1629_v42 = vld [vmem:[#allocation5 + $0x1c4] ss:$8 sps:$4 sm:$0xff]   ;;  %v1670_v43 = vld [vmem:[#allocation5 + $0x70] ss:$8 sps:$4 sm:$0xff]   ;;  %v1631_v45 = vld [vmem:[#allocation5 + $0x1c0] ss:$8 sps:$4 sm:$0xff]  }
  0x8f   :  { %827 = vmatprep.subr.bf16.mxu0 %v1602_v8  ;;  %772 = vmatprep.subr.bf16.mxu1 %v1644_v21  ;;  %v1674_v44 = vld [vmem:[#allocation5 + $0x84] ss:$8 sps:$4 sm:$0xff]   ;;  %v1635_v46 = vld [vmem:[#allocation5 + $0x1d4] ss:$8 sps:$4 sm:$0xff]   ;;  %v1676_v47 = vld [vmem:[#allocation5 + $0x80] ss:$8 sps:$4 sm:$0xff]  }
  0x90   :  { %v1680_v48 = vld [vmem:[#allocation5 + $0x94] ss:$8 sps:$4 sm:$0xff]   ;;  %v1637_v49 = vld [vmem:[#allocation5 + $0x1d0] ss:$8 sps:$4 sm:$0xff]   ;;  %v1641_v50 = vld [vmem:[#allocation5 + $0x1e4] ss:$8 sps:$4 sm:$0xff]  }
  0x91   :  { %v1682_v51 = vld [vmem:[#allocation5 + $0x90] ss:$8 sps:$4 sm:$0xff]   ;;  %v1686_v52 = vld [vmem:[#allocation5 + $0xa4] ss:$8 sps:$4 sm:$0xff]   ;;  %v1643_v53 = vld [vmem:[#allocation5 + $0x1e0] ss:$8 sps:$4 sm:$0xff]  }
  0x92   :  { %828 = vmatpush1.bf16.msra.mxu0 %v1604_v9  ;;  %773 = vmatpush1.bf16.msra.mxu1 %v1646_v24  ;;  %v1647_v54 = vld [vmem:[#allocation5 + $0x1f4] ss:$8 sps:$4 sm:$0xff]   ;;  %v1688_v55 = vld [vmem:[#allocation5 + $0xa0] ss:$8 sps:$4 sm:$0xff]   ;;  %v1649_v57 = vld [vmem:[#allocation5 + $0x1f0] ss:$8 sps:$4 sm:$0xff]  }
  0x93   :  { %829 = vmatprep.subr.bf16.mxu0 %v1605_v10  ;;  %774 = vmatprep.subr.bf16.mxu1 %v1650_v25  ;;  %v1692_v56 = vld [vmem:[#allocation5 + $0xb4] ss:$8 sps:$4 sm:$0xff]   ;;  %v1655_v58 = vld [vmem:[#allocation5 + $0x204] ss:$8 sps:$4 sm:$0xff]   ;;  %v1694_v61 = vld [vmem:[#allocation5 + $0xb0] ss:$8 sps:$4 sm:$0xff]  }
  0x94   :  { %v119_v59 = vld [vmem:[#allocation2 + $0x10] sm:$0xff]  ;;  %v126_v60 = vld [vmem:[#allocation2 + $0x48] sm:$0xff]  ;;  %v125_v0 = vld [vmem:[#allocation2 + $0x40] sm:$0xff]  ;;  %s1325_s0 = sshll.u32 %s1961_s6, 4  ;;  %s1326_s0 = int_to_ptr.vmem [resolvable:$true] %s1325_s0 }
  0x95   :  { %v1698_v62 = vld [vmem:[#allocation5 + $0xc4] ss:$8 sps:$4 sm:$0xff]   ;;  %v1653_v2 = vld [vmem:[#allocation5 + $0x200] ss:$8 sps:$4 sm:$0xff]   ;;  %v147_v3 = vpack.c.bf16 %v126_v60, %v119_v59  ;;  %v1661_v4 = vld [vmem:[#allocation5 + $0x214] ss:$8 sps:$4 sm:$0xff]   ;;  %p1920_p1 = scmp.lt.s32.totalorder %s1326_s0, %s1326_s0 }
  0x96   :  { %830 = vmatpush1.bf16.msra.mxu0 %v1607_v13  ;;  %775 = vmatpush1.bf16.msra.mxu1 %v1652_v31  ;;  %v118_v63 = vld [vmem:[#allocation2 + $0x8] sm:$0xff]  ;;  %v1704_v6 = vld [vmem:[#allocation5 + $0xd4] ss:$8 sps:$4 sm:$0xff]   ;;  %v1659_v7 = vld [vmem:[#allocation5 + $0x210] ss:$8 sps:$4 sm:$0xff]   ;;  %s1915_s8 = scalar_lea.vmem %s1326_s0, 256 }
  0x97   :  { %831 = vmatprep.subr.bf16.mxu0 %v1608_v16  ;;  %776 = vmatprep.subr.bf16.mxu1 %v1656_v32  ;;  %v146_v1 = vpack.c.bf16 %v125_v0, %v118_v63  ;;  %v1700_v5 = vld [vmem:[#allocation5 + $0xc0] ss:$8 sps:$4 sm:$0xff]   ;;  %v1667_v8 = vld [vmem:[#allocation5 + $0x224] ss:$8 sps:$4 sm:$0xff]   ;;  %v1706_v9 = vld [vmem:[#allocation5 + $0xd0] ss:$8 sps:$4 sm:$0xff]   ;;  %p1916_p0 = scmp.ne.s32.totalorder %s1326_s0, %s1915_s8  ;;  %p1921_p2 = scmp.lt.s32.totalorder %s1915_s8, %s1915_s8 }
  0x98   :  { %v134_v10 = vld [vmem:[#allocation2 + $0x88] sm:$0xff]  ;;  %v141_v11 = vld [vmem:[#allocation2 + $0xc0] sm:$0xff]  ;;  %v140_v13 = vld [vmem:[#allocation2 + $0xb8] sm:$0xff] }
  0x99   :  { %798 = vmatprep.mubr.bf16.mxu1 %v146_v1  ;;  %v133_v12 = vld [vmem:[#allocation2 + $0x80] sm:$0xff]  ;;  %v155_v15 = vpack.c.bf16 %v141_v11, %v134_v10  ;;  %v1673_v21 = vld [vmem:[#allocation5 + $0x234] ss:$8 sps:$4 sm:$0xff]   ;;  %v1718_v24 = vld [vmem:[#allocation5 + $0xf0] ss:$8 sps:$4 sm:$0xff]   ;;  %p1922_p3 = por %p1921_p2, %p1920_p1 }
  0x9a   :  { %832 = vmatpush1.bf16.msra.mxu0 %v1610_v17  ;;  %777 = vmatpush1.bf16.msra.mxu1 %v1658_v35  ;;  %v1710_v14 = vld [vmem:[#allocation5 + $0xe4] ss:$8 sps:$4 sm:$0xff]   ;;  %v154_v16 = vpack.c.bf16 %v140_v13, %v133_v12  ;;  %v1665_v18 = vld [vmem:[#allocation5 + $0x220] ss:$8 sps:$4 sm:$0xff]   ;;  %v124_v28 = vld [vmem:[#allocation2 + $0x38] sm:$0xff] }
  0x9b   :  { %833 = vmatprep.subr.bf16.mxu0 %v1611_v19  ;;  %778 = vmatprep.subr.bf16.mxu1 %v1662_v36  ;;  %v122_v17 = vld [vmem:[#allocation2 + $0x28] sm:$0xff]  ;;  %v129_v20 = vld [vmem:[#allocation2 + $0x60] sm:$0xff]  ;;  %v139_v31 = vld [vmem:[#allocation2 + $0xb0] sm:$0xff]  ;;  %p1923_p4 = pnand %p1922_p3, %p1916_p0 }
  0x9c   :  { %v1712_v19 = vld [vmem:[#allocation5 + $0xe0] ss:$8 sps:$4 sm:$0xff]   ;;  %v150_v25 = vpack.c.bf16 %v129_v20, %v122_v17  ;;  %v1679_v26 = vld [vmem:[#allocation5 + $0x244] ss:$8 sps:$4 sm:$0xff]   ;;  %v1737_v36 = vld [vmem:[#allocation8 + $0x40] sm:$0xff]  }
  0x9d   :  { %v117_v27 = vld [vmem:[#allocation2] sm:$0xff]  ;;  %v1721_v60 = vld [vmem:[#allocation5 + $0x2b4] ss:$8 sps:$4 sm:$0xff]   ;;  %v1728_v1 = vld [vmem:[#allocation5 + $0x2d0] ss:$8 sps:$4 sm:$0xff]  }
  0x9e   :  { %834 = vmatpush1.bf16.msra.mxu0 %v1613_v22  ;;  %779 = vmatpush1.bf16.msra.mxu1 %v1664_v39  ;;  %v1716_v22 = vld [vmem:[#allocation5 + $0xf4] ss:$8 sps:$4 sm:$0xff]   ;;  %v1677_v32 = vld [vmem:[#allocation5 + $0x240] ss:$8 sps:$4 sm:$0xff]   ;;  %v145_v35 = vpack.c.bf16 %v124_v28, %v117_v27 }
  0x9f   :  { %835 = vmatprep.subr.bf16.mxu0 %v1614_v23  ;;  %780 = vmatprep.subr.bf16.mxu1 %v1668_v40  ;;  %v1671_v23 = vld [vmem:[#allocation5 + $0x230] ss:$8 sps:$4 sm:$0xff]   ;;  %v138_v40 = vld [vmem:[#allocation2 + $0xa8] sm:$0xff]  ;;  %v1730_v0 = vld [vmem:[#allocation5 + $0x2d4] ss:$8 sps:$4 sm:$0xff]  }
  0xa0   :  { %v131_v39 = vld [vmem:[#allocation2 + $0x70] sm:$0xff]  ;;  %v1713_v59 = vld [vmem:[#allocation5 + $0x2a0] ss:$8 sps:$4 sm:$0xff]  }
  0xa1   :  { %v1722_v63 = vld [vmem:[#allocation5 + $0x2c0] ss:$8 sps:$4 sm:$0xff]   ;;  %v135_v12 = vld [vmem:[#allocation2 + $0x90] sm:$0xff] }
  0xa2   :  { %836 = vmatpush1.bf16.msra.mxu0 %v1616_v29  ;;  %781 = vmatpush1.bf16.msra.mxu1 %v1670_v43  ;;  %v1727_v29 = vld [vmem:[#allocation5 + $0x304] ss:$8 sps:$4 sm:$0xff]   ;;  %v1697_v43 = vld [vmem:[#allocation5 + $0x274] ss:$8 sps:$4 sm:$0xff]  }
  0xa3   :  { %837 = vmatprep.subr.bf16.mxu0 %v1617_v30  ;;  %782 = vmatprep.subr.bf16.mxu1 %v1674_v44  ;;  %v132_v30 = vld [vmem:[#allocation2 + $0x78] sm:$0xff]  ;;  %v152_v44 = vpack.c.bf16 %v138_v40, %v131_v39  ;;  %v142_v13 = vld [vmem:[#allocation2 + $0xc8] sm:$0xff] }
  0xa4   :  { %v1741_v17 = vld [vmem:[#allocation8 + $0x50] sm:$0xff]   ;;  %v1744_v20 = vld [vmem:[#allocation8 + $0x18] sm:$0xff]  }
  0xa5   :  { %v1751_v27 = vld [vmem:[#allocation8 + $0x78] sm:$0xff]  }
  0xa6   :  { %838 = vmatpush1.bf16.msra.mxu0 %v1619_v33  ;;  %783 = vmatpush1.bf16.msra.mxu1 %v1676_v47  ;;  %v1725_v33 = vld [vmem:[#allocation5 + $0x300] ss:$8 sps:$4 sm:$0xff]   ;;  %v1960_v47 = vmov 0  }
  0xa7   :  { %839 = vmatprep.subr.bf16.mxu0 %v1620_v34  ;;  %784 = vmatprep.subr.bf16.mxu1 %v1680_v48  ;;  %v1685_v34 = vld [vmem:[#allocation5 + $0x254] ss:$8 sps:$4 sm:$0xff]   ;;  %v130_v48 = vld [vmem:[#allocation2 + $0x68] sm:$0xff] }
  0xa8   :  { %v1752_v28 = vld [vmem:[#allocation8 + $0x38] sm:$0xff]  }
  0xaa   :  { %840 = vmatpush1.bf16.msra.mxu0 %v1622_v37  ;;  %785 = vmatpush1.bf16.msra.mxu1 %v1682_v51  ;;  %v153_v37 = vpack.c.bf16 %v139_v31, %v132_v30  ;;  %v1701_v51 = vld [vmem:[#allocation5 + $0x280] ss:$8 sps:$4 sm:$0xff]  }
  0xab   :  { %841 = vmatprep.subr.bf16.mxu0 %v1623_v38  ;;  %786 = vmatprep.subr.bf16.mxu1 %v1686_v52  ;;  %v1683_v38 = vld [vmem:[#allocation5 + $0x250] ss:$8 sps:$4 sm:$0xff]   ;;  %v1709_v52 = vld [vmem:[#allocation5 + $0x294] ss:$8 sps:$4 sm:$0xff]  }
  0xae   :  { %842 = vmatpush1.bf16.msra.mxu0 %v1625_v41  ;;  %787 = vmatpush1.bf16.msra.mxu1 %v1688_v55  ;;  %v1691_v41 = vld [vmem:[#allocation5 + $0x264] ss:$8 sps:$4 sm:$0xff]  }
  0xaf   :  { %843 = vmatprep.subr.bf16.mxu0 %v1629_v42  ;;  %788 = vmatprep.subr.bf16.mxu1 %v1692_v56  ;;  %v1689_v42 = vld [vmem:[#allocation5 + $0x260] ss:$8 sps:$4 sm:$0xff]   ;;  %v144_v56 = vld [vmem:[#allocation2 + $0xd8] sm:$0xff] }
  0xb0   :  { %v137_v55 = vld [vmem:[#allocation2 + $0xa0] sm:$0xff] }
  0xb2   :  { %844 = vmatpush1.bf16.msra.mxu0 %v1631_v45  ;;  %789 = vmatpush1.bf16.msra.mxu1 %v1694_v61  ;;  %v1695_v45 = vld [vmem:[#allocation5 + $0x270] ss:$8 sps:$4 sm:$0xff]  }
  0xb3   :  { %845 = vmatprep.subr.bf16.mxu0 %v1635_v46  ;;  %790 = vmatprep.subr.bf16.mxu1 %v1698_v62  ;;  %v123_v46 = vld [vmem:[#allocation2 + $0x30] sm:$0xff]  ;;  %v1724_v62 = vld [vmem:[#allocation5 + $0x2c4] ss:$8 sps:$4 sm:$0xff]  }
  0xb4   :  { %v1719_v61 = vld [vmem:[#allocation5 + $0x2b0] ss:$8 sps:$4 sm:$0xff]  }
  0xb6   :  { %846 = vmatpush1.bf16.msra.mxu0 %v1637_v49  ;;  %791 = vmatpush1.bf16.msra.mxu1 %v1700_v5  ;;  %v1703_v49 = vld [vmem:[#allocation5 + $0x284] ss:$8 sps:$4 sm:$0xff]   ;;  %v1734_v5 = vld [vmem:[#allocation5 + $0x2f0] ss:$8 sps:$4 sm:$0xff]  }
  0xb7   :  { %847 = vmatprep.subr.bf16.mxu0 %v1641_v50  ;;  %792 = vmatprep.subr.bf16.mxu1 %v1704_v6  ;;  %v151_v50 = vpack.c.bf16 %v130_v48, %v123_v46  ;;  %v121_v6 = vld [vmem:[#allocation2 + $0x20] sm:$0xff]  ;;  %v259_v46 = vlaneseq }
  0xba   :  { %848 = vmatpush1.bf16.msra.mxu0 %v1643_v53  ;;  %793 = vmatpush1.bf16.msra.mxu1 %v1706_v9  ;;  %v1738_v53 = vld [vmem:[#allocation8] sm:$0xff]  }
  0xbb   :  { %849 = vmatprep.subr.bf16.mxu0 %v1647_v54  ;;  %794 = vmatprep.subr.bf16.mxu1 %v1710_v14  ;;  %v1707_v54 = vld [vmem:[#allocation5 + $0x290] ss:$8 sps:$4 sm:$0xff]   ;;  %v156_v14 = vpack.c.bf16 %v142_v13, %v135_v12 }
  0xbc   :  { %v143_v9 = vld [vmem:[#allocation2 + $0xd0] sm:$0xff] }
  0xbe   :  { %850 = vmatpush1.bf16.msra.mxu0 %v1649_v57  ;;  %795 = vmatpush1.bf16.msra.mxu1 %v1712_v19  ;;  %v1715_v57 = vld [vmem:[#allocation5 + $0x2a4] ss:$8 sps:$4 sm:$0xff]  }
  0xbf   :  { %872 = vmatprep.subr.bf16.mxu0 %v1655_v58  ;;  %796 = vmatprep.subr.bf16.mxu1 %v1716_v22  ;;  %v158_v58 = vpack.c.bf16 %v144_v56, %v137_v55  ;;  %v1743_v19 = vld [vmem:[#allocation8 + $0x58] sm:$0xff]   ;;  %v1746_v22 = vld [vmem:[#allocation8 + $0x20] sm:$0xff]  }
  0xc1   :  { %852 = vmatmul.mubr.bf16.vlgmr.msra.gmra.mrb[0].mxu0 %v147_v3  ;;  %v1731_v3 = vld [vmem:[#allocation5 + $0x2e0] ss:$8 sps:$4 sm:$0xff]  }
  0xc2   :  { %873 = vmatpush1.bf16.msra.mxu0 %v1653_v2  ;;  %861 = vmatprep.mubr.bf16.mxu0 %v155_v15  ;;  %v1733_v2 = vld [vmem:[#allocation5 + $0x2e4] ss:$8 sps:$4 sm:$0xff]   ;;  %v1739_v15 = vld [vmem:[#allocation8 + $0x48] sm:$0xff]  }
  0xc3   :  { %874 = vmatprep.subr.bf16.mxu0 %v1661_v4  ;;  %797 = vmatpush1.bf16.msra.mxu1 %v1718_v24  ;;  %v1736_v4 = vld [vmem:[#allocation5 + $0x2f4] ss:$8 sps:$4 sm:$0xff]  }
  0xc4   :  { %925 = vmatprep.subr.bf16.mxu1 %v1727_v29  ;;  %v1748_v24 = vld [vmem:[#allocation8 + $0x28] sm:$0xff]  }
  0xc5   :  { %v2101_v29 = vld [vmem:[#allocation11] sm:$0xff]  }
  0xc6   :  { %875 = vmatpush1.bf16.msra.mxu0 %v1659_v7  ;;  %799 = vmatmul.mubr.bf16.vlgmr.msra.gmra.mrb[0].mxu1 %v145_v35  ;;  %v128_v7 = vld [vmem:[#allocation2 + $0x58] sm:$0xff] }
  0xc7   :  { %876 = vmatprep.subr.bf16.mxu0 %v1667_v8  ;;  %926 = vmatpush1.bf16.msra.mxu1 %v1725_v33  ;;  %v136_v8 = vld [vmem:[#allocation2 + $0x98] sm:$0xff]  ;;  %v149_v10 = vpack.c.bf16 %v128_v7, %v121_v6 }
  0xc8   :  { %808 = vmatprep.mubr.bf16.mxu1 %v153_v37  ;;  %1485 = vmatprep.subr.bf16.mxu1 %v1737_v36  ;;  %v157_v11 = vpack.c.bf16 %v143_v9, %v136_v8 }
  0xc9   :  { %862 = vmatmul.mubr.bf16.gmra.mrb[4].mxu0 %v154_v16  ;;  %v1740_v16 = vld [vmem:[#allocation8 + $0x8] sm:$0xff]  }
  0xca   :  { %877 = vmatpush1.bf16.msra.mxu0 %v1665_v18  ;;  %904 = vmatprep.mubr.bf16.mxu0 %v150_v25  ;;  %v1742_v18 = vld [vmem:[#allocation8 + $0x10] sm:$0xff]  }
  0xcb   :  { %878 = vmatprep.subr.bf16.mxu0 %v1673_v21  ;;  %v1745_v21 = vld [vmem:[#allocation8 + $0x60] sm:$0xff]   ;;  %v1749_v25 = vld [vmem:[#allocation8 + $0x70] sm:$0xff]  }
  0xce   :  { %879 = vmatpush1.bf16.msra.mxu0 %v1671_v23  ;;  %809 = vmatmul.mubr.bf16.gmra.mrb[4].mxu1 %v152_v44  ;;  %v1747_v23 = vld [vmem:[#allocation8 + $0x68] sm:$0xff]  }
  0xcf   :  { %880 = vmatprep.subr.bf16.mxu0 %v1679_v26  ;;  %957 = vmatprep.mubr.bf16.mxu1 %v1960_v47  ;;  %v1750_v26 = vld [vmem:[#allocation8 + $0x30] sm:$0xff]  }
  0xd2   :  { %881 = vmatpush1.bf16.msra.mxu0 %v1677_v32 }
  0xd3   :  { %882 = vmatprep.subr.bf16.mxu0 %v1685_v34 }
  0xd6   :  { %883 = vmatpush1.bf16.msra.mxu0 %v1683_v38  ;;  %1438 = vmatmul.mubr.msk.bf16.vlgmr.msra.gmra.mrb[8].mxu1 %vm759_vm0, %v151_v50 }
  0xd7   :  { %884 = vmatprep.subr.bf16.mxu0 %v1691_v41  ;;  %967 = vmatprep.mubr.bf16.mxu1 %v1960_v47  ;;  %v260_v47 = vshrl.u32 %v259_v46, 7 }
  0xd8   :  { %1486 = vmatpush3.bf16.msra.mxu1 %v1738_v53 }
  0xd9   :  { %1487 = vmatprep.subr.bf16.mxu1 %v1739_v15  ;;  %v261_v48 = vsub.s32 0, %v260_v47  ;;  %v265_v50 = vsub.s32 1, %v260_v47 }
  0xda   :  { %885 = vmatpush1.bf16.msra.mxu0 %v1689_v42 }
  0xdb   :  { %886 = vmatprep.subr.bf16.mxu0 %v1697_v43 }
  0xdc   :  { %1488 = vmatpush3.bf16.msra.mxu1 %v1740_v16 }
  0xdd   :  { %1489 = vmatprep.subr.bf16.mxu1 %v1741_v17 }
  0xde   :  { %887 = vmatpush1.bf16.msra.mxu0 %v1695_v45  ;;  %1439 = vmatmul.mubr.msk.bf16.gmra.mrb[12].mxu1 %vm759_vm0, %v158_v58 }
  0xdf   :  { %888 = vmatprep.subr.bf16.mxu0 %v1703_v49  ;;  %v257_v49 = vld [vmem:[#allocation7] sm:$0x3] }
  0xe0   :  { %1490 = vmatpush3.bf16.msra.mxu1 %v1742_v18 }
  0xe1   :  { %1491 = vmatprep.subr.bf16.mxu1 %v1743_v19 }
  0xe2   :  { %889 = vmatpush1.bf16.msra.mxu0 %v1701_v51  ;;  %v262_v51 = vrot.slane %v257_v49, %v261_v48 }
  0xe3   :  { %890 = vmatprep.subr.bf16.mxu0 %v1709_v52  ;;  %v266_v52 = vrot.slane %v257_v49, %v265_v50 }
  0xe4   :  { %1492 = vmatpush3.bf16.msra.mxu1 %v1744_v20 }
  0xe5   :  { %1493 = vmatprep.subr.bf16.mxu1 %v1745_v21 }
  0xe6   :  { %891 = vmatpush1.bf16.msra.mxu0 %v1707_v54 }
  0xe7   :  { %892 = vmatprep.subr.bf16.mxu0 %v1715_v57 }
  0xe8   :  { %1494 = vmatpush3.bf16.msra.mxu1 %v1746_v22 }
  0xe9   :  { %1495 = vmatprep.subr.bf16.mxu1 %v1747_v23  ;;  %v1754_v23 = vld [vmem:[#allocation11 + $0x8] sm:$0xff]  }
  0xea   :  { %893 = vmatpush1.bf16.msra.mxu0 %v1713_v59 }
  0xeb   :  { %894 = vmatprep.subr.bf16.mxu0 %v1721_v60 }
  0xec   :  { %1496 = vmatpush3.bf16.msra.mxu1 %v1748_v24 }
  0xed   :  { %1497 = vmatprep.subr.bf16.mxu1 %v1749_v25 }
  0xee   :  { %895 = vmatpush1.bf16.msra.mxu0 %v1719_v61 }
  0xef   :  { %896 = vmatprep.subr.bf16.mxu0 %v1724_v62 }
  0xf0   :  { %1498 = vmatpush3.bf16.msra.mxu1 %v1750_v26 }
  0xf1   :  { %1499 = vmatprep.subr.bf16.mxu1 %v1751_v27 }
  0xf2   :  { %897 = vmatpush1.bf16.msra.mxu0 %v1722_v63 }
  0xf3   :  { %898 = vmatprep.subr.bf16.mxu0 %v1730_v0 }
  0xf4   :  { %1500 = vmatpush3.bf16.msra.mxu1 %v1752_v28 }
  0xf5   :  { %1523 = vmatprep.subr.bf16.mxu1 %v2101_v29 }
  0xf6   :  { %899 = vmatpush1.bf16.msra.mxu0 %v1728_v1 }
  0xf7   :  { %900 = vmatprep.subr.bf16.mxu0 %v1733_v2 }
  0xfa   :  { %901 = vmatpush1.bf16.msra.mxu0 %v1731_v3 }
  0xfb   :  { %902 = vmatprep.subr.bf16.mxu0 %v1736_v4 }
  0xfe   :  { %903 = vmatpush1.bf16.msra.mxu0 %v1734_v5 }
 0x101   :  { %905 = vmatmul.mubr.bf16.vlgmr.msra.gmra.mrb[0].mxu0 %v149_v10 }
 0x102   :  { %914 = vmatprep.mubr.bf16.mxu0 %v157_v11 }
 0x109   :  { %915 = vmatmul.mubr.bf16.gmra.mrb[4].mxu0 %v156_v14 }
 0x199   :  { %v800_v30 = vpop.f32.mrb[0].mxu1 }
 0x19a   :  { %v802_v31 = vpop.f32.mrb[1].mxu1  ;;  %v801_v53 = vadd.f32 %v800_v30, %v262_v51 }
 0x19b   :  { %v804_v32 = vpop.f32.mrb[2].mxu1  ;;  %v803_v54 = vadd.f32 %v802_v31, %v266_v52  ;;  %v1755_v31 = vld [vmem:[#allocation11 + $0x10] sm:$0xff]  }
 0x19c   :  { %v806_v33 = vpop.f32.mrb[3].mxu1  ;;  %v805_v56 = vadd.f32 %v804_v32, %v262_v51 }
 0x19d   :  { %v807_v59 = vadd.f32 %v806_v33, %v266_v52 }
 0x1a1   :  { %v810_v34 = vpop.f32.mrb[4].mxu1 }
 0x1a2   :  { %v812_v35 = vpop.f32.mrb[5].mxu1  ;;  %v811_v5 = vadd.f32 %v810_v34, %v262_v51 }
 0x1a3   :  { %v814_v36 = vpop.f32.mrb[6].mxu1  ;;  %v813_v8 = vadd.f32 %v812_v35, %v266_v52 }
 0x1a4   :  { %v816_v37 = vpop.f32.mrb[7].mxu1  ;;  %v815_v12 = vadd.f32 %v814_v36, %v262_v51  ;;  %v1756_v36 = vld [vmem:[#allocation11 + $0x18] sm:$0xff]  }
 0x1a5   :  { %v817_v16 = vadd.f32 %v816_v37, %v266_v52  ;;  %v1757_v37 = vld [vmem:[#allocation11 + $0x20] sm:$0xff]  }
 0x1a9   :  { %v959_v38 = vpop.f32.mrb[8].mxu1 }
 0x1aa   :  { %v961_v39 = vpop.f32.mrb[9].mxu1 }
 0x1ab   :  { %v963_v40 = vpop.f32.mrb[10].mxu1 }
 0x1ac   :  { %v965_v41 = vpop.f32.mrb[11].mxu1 }
 0x1b1   :  { %v969_v42 = vpop.f32.mrb[12].mxu1 }
 0x1b2   :  { %v971_v43 = vpop.f32.mrb[13].mxu1 }
 0x1b3   :  { %v973_v44 = vpop.f32.mrb[14].mxu1 }
 0x1b4   :  { %v975_v45 = vpop.f32.mrb[15].mxu1 }
 0x1d4   :  { %v906_v55 = vpop.f32.mrb[0].mxu0 }
 0x1d5   :  { %v1544_v57 = vadd.f32 %v906_v55, %v801_v53  ;;  %v908_v58 = vpop.f32.mrb[1].mxu0 }
 0x1d6   :  { %v1547_v60 = vadd.f32 %v908_v58, %v803_v54  ;;  %v910_v61 = vpop.f32.mrb[2].mxu0 }
 0x1d7   :  { %v1545_v62 = vadd.f32 %v1544_v57, %v959_v38  ;;  %v1550_v63 = vadd.f32 %v910_v61, %v805_v56  ;;  %v912_v0 = vpop.f32.mrb[3].mxu0  ;;  %v1759_v38 = vld [vmem:[#allocation11 + $0x30] sm:$0xff]  }
 0x1d8   :  { %v1548_v1 = vadd.f32 %v1547_v60, %v961_v39  ;;  %v1553_v2 = vadd.f32 %v912_v0, %v807_v59  ;;  %v1760_v39 = vld [vmem:[#allocation11 + $0x38] sm:$0xff]   ;;  %v1457_v0 = vld [vmem:[#allocation13] ss:$0 sm:$0xff] }
 0x1d9   :  { %v1551_v3 = vadd.f32 %v1550_v63, %v963_v40  ;;  %v978_v6 = vmax.f32 %v1545_v62, 0.0 }
 0x1da   :  { %v1554_v4 = vadd.f32 %v1553_v2, %v965_v41  ;;  %v979_v9 = vmax.f32 %v1548_v1, 0.0  ;;  %v1440_v41 = vld [vmem:[#allocation10] ss:$0 sm:$0xff] }
 0x1db   :  { %v980_v7 = vmax.f32 %v1551_v3, 0.0 }
 0x1dc   :  { %v981_v10 = vmax.f32 %v1554_v4, 0.0  ;;  %v916_v11 = vpop.f32.mrb[4].mxu0 }
 0x1dd   :  { %v986_v13 = vpack.c.bf16 %v980_v7, %v978_v6  ;;  %v1556_v14 = vadd.f32 %v916_v11, %v811_v5  ;;  %v918_v15 = vpop.f32.mrb[5].mxu0 }
 0x1de   :  { %v1559_v17 = vadd.f32 %v918_v15, %v813_v8  ;;  %v920_v18 = vpop.f32.mrb[6].mxu0  ;;  %v987_v19 = vpack.c.bf16 %v981_v10, %v979_v9 }
 0x1df   :  { %v1557_v20 = vadd.f32 %v1556_v14, %v969_v42  ;;  %v1562_v21 = vadd.f32 %v920_v18, %v815_v12  ;;  %v922_v22 = vpop.f32.mrb[7].mxu0 }
 0x1e0   :  { %v1560_v24 = vadd.f32 %v1559_v17, %v971_v43  ;;  %v1565_v25 = vadd.f32 %v922_v22, %v817_v16  ;;  %1157 = vmatprep.mubr.bf16.mxu1 %v987_v19 }
 0x1e1   :  { %v1563_v26 = vadd.f32 %v1562_v21, %v973_v44  ;;  %1158 = vmatmul.mubr.bf16.vlgmr.msra.gmra.mrb[16].mxu1 %v986_v13  ;;  %v982_v28 = vmax.f32 %v1557_v20, 0.0 }
 0x1e2   :  { %v1566_v27 = vadd.f32 %v1565_v25, %v975_v45  ;;  %1524 = vmatpush3.bf16.msra.mxu1 %v2101_v29  ;;  %v983_v32 = vmax.f32 %v1560_v24, 0.0  ;;  %v1758_v29 = vld [vmem:[#allocation11 + $0x28] sm:$0xff]  }
 0x1e3   :  { %v984_v30 = vmax.f32 %v1563_v26, 0.0  ;;  %1525 = vmatprep.subr.bf16.mxu1 %v1754_v23 }
 0x1e4   :  { %v985_v33 = vmax.f32 %v1566_v27, 0.0 }
 0x1e5   :  { %v988_v34 = vpack.c.bf16 %v984_v30, %v982_v28 }
 0x1e6   :  { %v989_v35 = vpack.c.bf16 %v985_v33, %v983_v32  ;;  %1526 = vmatpush3.bf16.msra.mxu1 %v1754_v23 }
 0x1e7   :  { %1527 = vmatprep.subr.bf16.mxu1 %v1755_v31 }
 0x1e8   :  { %1165 = vmatprep.mubr.bf16.mxu1 %v989_v35 }
 0x1e9   :  { %1166 = vmatmul.mubr.bf16.gmra.mrb[20].mxu1 %v988_v34 }
 0x1ea   :  { %1528 = vmatpush3.bf16.msra.mxu1 %v1755_v31 }
 0x1eb   :  { %1529 = vmatprep.subr.bf16.mxu1 %v1756_v36 }
 0x1ee   :  { %1530 = vmatpush3.bf16.msra.mxu1 %v1756_v36 }
 0x1ef   :  { %1531 = vmatprep.subr.bf16.mxu1 %v1757_v37 }
 0x1f2   :  { %1532 = vmatpush3.bf16.msra.mxu1 %v1757_v37 }
 0x1f3   :  { %1533 = vmatprep.subr.bf16.mxu1 %v1758_v29 }
 0x1f6   :  { %1534 = vmatpush3.bf16.msra.mxu1 %v1758_v29 }
 0x1f7   :  { %1535 = vmatprep.subr.bf16.mxu1 %v1759_v38 }
 0x1fa   :  { %1536 = vmatpush3.bf16.msra.mxu1 %v1759_v38 }
 0x1fb   :  { %1537 = vmatprep.subr.bf16.mxu1 %v1760_v39 }
 0x1fe   :  { %1538 = vmatpush3.bf16.msra.mxu1 %v1760_v39 }
 0x2b4   :  { %v1501_v40 = vpop.f32.mrb[16].mxu1 }
 0x2b5   :  { %v1502_v42 = vpop.f32.mrb[17].mxu1 }
 0x2b6   :  { %v1503_v43 = vadd.f32 %v1502_v42, %v1501_v40  ;;  %v1504_v44 = vpop.f32.mrb[18].mxu1 }
 0x2b7   :  { %v1505_v45 = vpop.f32.mrb[19].mxu1 }
 0x2b8   :  { %v1160_v46 = vadd.f32 %v1503_v43, %v1440_v41  ;;  %v1506_v47 = vadd.f32 %v1505_v45, %v1504_v44 }
 0x2ba   :  { %v1163_v48 = vadd.f32 %v1506_v47, %v1440_v41  ;;  %v1174_v49 = vmax.f32 %v1160_v46, 0.0 }
 0x2bc   :  { %v1175_v50 = vmax.f32 %v1163_v48, 0.0  ;;  %v1507_v51 = vpop.f32.mrb[20].mxu1 }
 0x2bd   :  { %v1508_v52 = vpop.f32.mrb[21].mxu1 }
 0x2be   :  { %v1509_v53 = vadd.f32 %v1508_v52, %v1507_v51  ;;  %v1510_v54 = vpop.f32.mrb[22].mxu1  ;;  %v1178_v55 = vpack.c.bf16 %v1175_v50, %v1174_v49 }
 0x2bf   :  { %v1511_v56 = vpop.f32.mrb[23].mxu1 }
 0x2c0   :  { %v1168_v57 = vadd.f32 %v1509_v53, %v1440_v41  ;;  %v1512_v58 = vadd.f32 %v1511_v56, %v1510_v54  ;;  %1539 = vmatprep.mubr.bf16.mxu1 %v1178_v55 }
 0x2c2   :  { %v1171_v59 = vadd.f32 %v1512_v58, %v1440_v41  ;;  %v1176_v60 = vmax.f32 %v1168_v57, 0.0 }
 0x2c4   :  { %v1177_v61 = vmax.f32 %v1171_v59, 0.0 }
 0x2c6   :  { %v1179_v62 = vpack.c.bf16 %v1177_v61, %v1176_v60 }
 0x2c8   :  { %1540 = vmatmul.mubr.bf16.vlgmr.msra.gmra.mrb[24].mxu1 %v1179_v62 }
 0x39b   :  { %v1541_v63 = vpop.f32.mrb[24].mxu1 }
 0x39c   :  { %v1285_v1 = vpop.f32.mrb[25].mxu1  ;;  %v1294_v3 = vadd.f32 %v1541_v63, %v1457_v0 }
 0x39d   :  { %v1542_v2 = vpop.f32.mrb[26].mxu1  ;;  %v1286_v6 = vadd.f32 %v1457_v0, %v1285_v1 }
 0x39e   :  { %v1297_v4 = vadd.f32 %v1542_v2, %v1457_v0  ;;  %v1288_v5 = vpop.f32.mrb[27].mxu1 }
 0x39f   :  { %v1289_v7 = vadd.f32 %v1457_v0, %v1288_v5 }
 0x3a0   :  { %v1482_v8 = vpack.c.bf16 %v1297_v4, %v1294_v3 }
 0x3a1   :  { %v1477_v9 = vpack.c.bf16 %v1289_v7, %v1286_v6 }
 0x3a2   :  { %1484 = vst [vmem:[#allocation14 + $0x8] sm:$0xff] %v1482_v8  }
 0x3a3   :  { %1478 = vst [vmem:[#allocation14] sm:$0xff] %v1477_v9  }
 0x3a4   :  { %1926 = shalt.err (!%p1923_p4)
}
 0x3a5   :  { %s1927_s20 = scalar_lea.hbm %s2127_s7, 256 }
 0x3a6   :  { %p1928_p5 = scmp.ne.s32.totalorder %s2127_s7, %s1927_s20  ;;  %p1931_p6 = scmp.lt.u32.totalorder %s1927_s20, %s2127_s7 }
 0x3a8   :  { %p1933_p7 = pnand %p1931_p6, %p1928_p5 }
 0x3aa   :  { %1936 = shalt.err (!%p1933_p7)
}
 0x3ab   :  { %1331 = dma.vmem_to_hbm [thread:$0]  %s1326_s0, 256, %s2127_s7, [#allocation4], %s1951_s1, %s1951_s1, %s1952_s25  }
 0x3ac   :  { %1945 = dma.done.wait [#allocation4], 256  }
 0x3ad   :  { %1946 = vsyncadd [#allocation4], 4294967040 }
 0x3ae   :  { %1335 = vsyncpa [#allocation3], 1 }
 0x3af   :  { %1336 = vsyncpa [#allocation6], 1 }
 0x3b0   :  { %1337 = vsyncpa [#allocation9], 1 }
 0x3b1   :  { %1338 = vsyncpa [#allocation12], 1 }
 0x3b2   :  { %1339 = vsyncpa [#allocation4], 1 }

</bundles_post_ra>
